<compile_context>
chip_gen: v5e
topology: v5e:2x2
jax: 0.10.0
libtpu: 0.0.40
codegen_flags: <defaults>
</compile_context>

<pallas_src>
import functools

import numpy as np
import jax
import jax.numpy as jnp
from jax.experimental import pallas as pl
from jax.experimental.pallas import tpu as pltpu


# --------------------------------------------------------------------------
# VMEM budgeting helpers
# --------------------------------------------------------------------------
def _tpu_vmem_bytes():
    """Physical per-core VMEM; falls back to a v7x-safe 64 MiB."""
    try:
        cap = int(pltpu.get_tpu_info().vmem_capacity_bytes)
        if cap > 0:
            return cap
    except Exception:
        pass
    return 64 * 1024 * 1024


def _largest_tile(total, max_tile):
    """Largest tile <= max_tile that equals `total` or is a multiple-of-8 divisor."""
    total = int(total)
    max_tile = int(max_tile)
    if total <= max_tile:
        return total
    t = min((max_tile // 8) * 8, total)
    while t >= 8:
        if total % t == 0:
            return t
        t -= 8
    return total   # fallback: untiled (only when total is not a multiple of 8)


# --------------------------------------------------------------------------
# Kernel 1: per-(teacher crop q, student crop v != q, batch tile) cls CE rows
#   ce[q, v', b] = -softmax((t_q[b]-center)/temp) . log_softmax(s_v[b]/stemp)
# plus fused per-(q, batch-tile) teacher-cls center partial sums.
# --------------------------------------------------------------------------
def _cls_loss_kernel(t_ref, s_ref, c_ref, ce_ref, csum_ref, te_ref, tden_ref, *,
                     inv_temp, inv_student_temp):
    vp = pl.program_id(2)   # reduced student-crop axis (diagonal removed)

    # Runs once per (q, batch tile): v' is innermost and the teacher block index
    # is v'-invariant, so the teacher DMA is also elided across v'.
    @pl.when(vp == 0)
    def _():
        t32 = t_ref[0].astype(jnp.float32)                            # (TB, D)
        # fused teacher-cls center partial sum for this (q, bt) tile,
        # broadcast over 8 sublanes to keep the output block (8, D)-tiled.
        part = jnp.sum(t32, axis=0, keepdims=True)                    # (1, D)
        csum_ref[...] = jnp.broadcast_to(part[None], csum_ref.shape)
        # teacher softmax numerator (normalization deferred) cached for all v'.
        t = (t32 - c_ref[...].astype(jnp.float32)) * inv_temp
        t = t - jnp.max(t, axis=-1, keepdims=True)
        te = jnp.exp(t)
        te_ref[...] = te
        tden_ref[...] = jnp.sum(te, axis=-1, keepdims=True)

    s = s_ref[0].astype(jnp.float32) * inv_student_temp               # (TB, D)
    sm = s - jnp.max(s, axis=-1, keepdims=True)
    lse = jnp.log(jnp.sum(jnp.exp(sm), axis=-1, keepdims=True))       # (TB, 1)
    cross = jnp.sum(te_ref[...] * sm, axis=-1, keepdims=True)         # (TB, 1)
    # -sum_d softmax(t) * log_softmax(s) == lse - (sum_d e^t' * s') / sum_d e^t'
    ce = lse - cross / tden_ref[...]                                  # (TB, 1)
    ce_ref[...] = ce[None, None]


def _cls_pair_losses(teacher_cls3, student_cls3, center, *, temp, student_temp,
                     ngcrops, ncrops, tb, vmem_limit):
    _, B, D = teacher_cls3.shape
    nbt = B // tb
    kernel = functools.partial(_cls_loss_kernel,
                               inv_temp=float(1.0 / temp),
                               inv_student_temp=float(1.0 / student_temp))

    def _student_idx(q, bt, vp):
        # skip the diagonal: student crop v = v' + (v' >= q)
        return (vp + jnp.where(vp >= q, 1, 0), bt, 0)

    ce_rows, csum = pl.pallas_call(
        kernel,
        out_shape=(jax.ShapeDtypeStruct((ngcrops, ncrops - 1, B, 1), jnp.float32),
                   jax.ShapeDtypeStruct((ngcrops, nbt * 8, D), jnp.float32)),
        grid=(ngcrops, nbt, ncrops - 1),
        in_specs=[
            pl.BlockSpec((1, tb, D), lambda q, bt, vp: (q, bt, 0)),    # teacher
            pl.BlockSpec((1, tb, D), _student_idx),                    # student
            pl.BlockSpec((1, D), lambda q, bt, vp: (0, 0)),            # center
        ],
        out_specs=(
            pl.BlockSpec((1, 1, tb, 1), lambda q, bt, vp: (q, vp, bt, 0)),
            pl.BlockSpec((1, 8, D), lambda q, bt, vp: (q, bt, 0)),
        ),
        scratch_shapes=[pltpu.VMEM((tb, D), jnp.float32),   # cached teacher exp()
                        pltpu.VMEM((tb, 1), jnp.float32)],  # cached teacher denom
        compiler_params=pltpu.CompilerParams(
            dimension_semantics=("parallel", "parallel", "arbitrary"),
            vmem_limit_bytes=vmem_limit),
    )(teacher_cls3, student_cls3, center)
    return ce_rows, csum


# --------------------------------------------------------------------------
# Kernel 2: masked patch (MIM) loss, tiled over batch rows and patches
#   num[i, b] = sum_n ce(b, n) * mask(b, n),  den[i, b] = sum_n mask(b, n)
# plus fused per-(crop, batch tile) teacher-patch center partial sums.
# --------------------------------------------------------------------------
def _mim_loss_kernel(t_ref, s_ref, c2_ref, m_ref, num_ref, den_ref, psum_ref, *,
                     inv_temp2, inv_student_temp):
    j = pl.program_id(2)   # patch-chunk axis (reduction, innermost)

    t32 = t_ref[...].astype(jnp.float32)                              # (TB, C, D2)

    @pl.when(j == 0)
    def _():
        num_ref[...] = jnp.zeros_like(num_ref)
        den_ref[...] = jnp.zeros_like(den_ref)
        psum_ref[...] = jnp.zeros_like(psum_ref)

    # fused teacher-patch center partial sum (padded patches are zero).
    part = jnp.sum(jnp.sum(t32, axis=1), axis=0, keepdims=True)       # (1, D2)
    psum_ref[...] += jnp.broadcast_to(part[None], psum_ref.shape)

    # teacher softmax numerator / denominator (normalization deferred).
    t = (t32 - c2_ref[...].astype(jnp.float32)) * inv_temp2
    t = t - jnp.max(t, axis=-1, keepdims=True)
    te = jnp.exp(t)
    tden = jnp.sum(te, axis=-1)                                       # (TB, C)

    s = s_ref[...].astype(jnp.float32) * inv_student_temp
    sm = s - jnp.max(s, axis=-1, keepdims=True)
    lse = jnp.log(jnp.sum(jnp.exp(sm), axis=-1))                      # (TB, C)
    cross = jnp.sum(te * sm, axis=-1)                                 # (TB, C)
    ce = lse - cross / tden                                           # (TB, C)

    mask = m_ref[0, 0]                                                # (TB, C) f32
    num_ref[...] += jnp.sum(ce * mask, axis=-1, keepdims=True)[None]
    den_ref[...] += jnp.sum(mask, axis=-1, keepdims=True)[None]


def _mim_losses(teacher_patch, student_patch, center2, mask_chunked, *,
                temp2, student_temp, ngcrops, tbp, chunk, vmem_limit):
    MB, n_pad, D2 = teacher_patch.shape
    B = MB // ngcrops
    nbt = B // tbp
    n_chunks = n_pad // chunk
    kernel = functools.partial(_mim_loss_kernel,
                               inv_temp2=float(1.0 / temp2),
                               inv_student_temp=float(1.0 / student_temp))

    def _patch_idx(i, bt, j):
        return (i * nbt + bt, j, 0)

    num, den, psum = pl.pallas_call(
        kernel,
        out_shape=(jax.ShapeDtypeStruct((ngcrops, B, 1), jnp.float32),
                   jax.ShapeDtypeStruct((ngcrops, B, 1), jnp.float32),
                   jax.ShapeDtypeStruct((ngcrops, nbt * 8, D2), jnp.float32)),
        grid=(ngcrops, nbt, n_chunks),
        in_specs=[
            pl.BlockSpec((tbp, chunk, D2), _patch_idx),                    # teacher
            pl.BlockSpec((tbp, chunk, D2), _patch_idx),                    # student
            pl.BlockSpec((1, 1, D2), lambda i, bt, j: (0, 0, 0)),          # center2
            pl.BlockSpec((1, 1, tbp, chunk), lambda i, bt, j: (i, j, bt, 0)),
        ],
        out_specs=(
            pl.BlockSpec((1, tbp, 1), lambda i, bt, j: (i, bt, 0)),
            pl.BlockSpec((1, tbp, 1), lambda i, bt, j: (i, bt, 0)),
            pl.BlockSpec((1, 8, D2), lambda i, bt, j: (i, bt, 0)),
        ),
        compiler_params=pltpu.CompilerParams(
            dimension_semantics=("parallel", "parallel", "arbitrary"),
            vmem_limit_bytes=vmem_limit),
    )(teacher_patch, student_patch, center2, mask_chunked)
    return num, den, psum


# --------------------------------------------------------------------------
# Module-level wrapper mirroring SMKDLoss (labels=None, lambda2=0 path)
# --------------------------------------------------------------------------
class SMKDLossPallas:
    def __init__(self, out_dim, patch_out_dim, ngcrops, nlcrops,
                 warmup_teacher_temp, teacher_temp,
                 warmup_teacher_temp2, teacher_temp2,
                 warmup_teacher_temp_epochs, nepochs,
                 student_temp=0.1, center_momentum=0.9, center_momentum2=0.9,
                 lambda1=1.0, lambda2=0.0, lambda3=1.0, mim_start_epoch=0,
                 input_dtype=jnp.bfloat16,
                 cls_block_rows=None, patch_block_rows=None, patch_chunk=None):
        self.student_temp = student_temp
        self.center_momentum = center_momentum
        self.center_momentum2 = center_momentum2
        self.ngcrops = ngcrops
        self.nlcrops = nlcrops
        self.ncrops = ngcrops + nlcrops
        self.lambda1 = lambda1
        self.lambda2 = lambda2
        self.lambda3 = lambda3
        self.input_dtype = input_dtype          # bf16 streaming (feedback)
        self.cls_block_rows = cls_block_rows    # None -> VMEM-budget derived
        self.patch_block_rows = patch_block_rows
        self.patch_chunk = patch_chunk

        vmem = _tpu_vmem_bytes()
        # explicit per-generation limits: ~112 MiB on v5e/v6e, ~56 MiB on v7x.
        self._vmem_limit = int(min(vmem * 7 // 8, 120 * 1024 * 1024))
        self._tile_budget = int(vmem * 9 // 16)

        # buffers (deterministic init, as nn.Module.register_buffer of zeros)
        self.center = jnp.zeros((1, out_dim), jnp.float32)
        self.center2 = jnp.zeros((1, 1, patch_out_dim), jnp.float32)
        self.teacher_temp_schedule = np.concatenate(
            (np.linspace(warmup_teacher_temp, teacher_temp, warmup_teacher_temp_epochs),
             np.ones(nepochs - warmup_teacher_temp_epochs) * teacher_temp))
        if mim_start_epoch == 0:
            self.teacher_temp2_schedule = np.concatenate(
                (np.linspace(warmup_teacher_temp2, teacher_temp2, warmup_teacher_temp_epochs),
                 np.ones(nepochs - warmup_teacher_temp_epochs) * teacher_temp2))
        else:
            self.teacher_temp2_schedule = np.concatenate(
                (np.ones(mim_start_epoch) * warmup_teacher_temp2,
                 np.linspace(warmup_teacher_temp2, teacher_temp2, warmup_teacher_temp_epochs),
                 np.ones(nepochs - warmup_teacher_temp_epochs - mim_start_epoch) * teacher_temp2))

    # ----- tiling derived from the VMEM budget (bf16 inputs, f32 temps) -----
    def _cls_rows(self, B, D, in_bytes):
        if self.cls_block_rows is not None:
            return _largest_tile(B, self.cls_block_rows)
        bytes_per_row = D * (4 * in_bytes + 16)
        return _largest_tile(B, max(8, self._tile_budget // bytes_per_row))

    def _patch_tiles(self, B, N, D2, in_bytes):
        if self.patch_chunk is not None:
            chunk = max(8, (int(self.patch_chunk) // 8) * 8)
        else:
            chunk = None
            if N % 8 == 0:
                c = min(128, (N // 8) * 8)
                while c >= 8:
                    if N % c == 0:
                        chunk = c
                        break
                    c -= 8
            if chunk is None:
                chunk = min(128, ((N + 7) // 8) * 8)
        n_pad = ((N + chunk - 1) // chunk) * chunk
        bytes_per_row = chunk * D2 * (4 * in_bytes + 16)
        max_rows = max(8, self._tile_budget // bytes_per_row)
        if self.patch_block_rows is not None:
            max_rows = min(max_rows, self.patch_block_rows)
        tbp = _largest_tile(B, max_rows)
        return tbp, chunk, n_pad

    def __call__(self, student_output, teacher_output, student_local_cls,
                 student_mask, epoch):
        # TODO(synk): the `type(teacher_output[1]) == tuple` attention-feature
        # branch (only needed for the lambda2/EMD path) is not ported.
        student_cls, student_patch = student_output[0]
        teacher_cls, teacher_patch = teacher_output[0]
        if student_local_cls is not None:
            student_cls = jnp.concatenate([student_cls, student_local_cls], axis=0)

        temp = float(self.teacher_temp_schedule[epoch])
        temp2 = float(self.teacher_temp2_schedule[epoch])

        M, D = teacher_cls.shape
        B = M // self.ngcrops
        N, D2 = teacher_patch.shape[1], teacher_patch.shape[2]
        in_dt = self.input_dtype
        in_bytes = jnp.dtype(in_dt).itemsize

        # ---- loss1: cls cross-entropy over crop pairs (+ fused cls center sum) ----
        t_cls3 = teacher_cls.astype(in_dt).reshape(self.ngcrops, B, D)
        s_cls3 = student_cls.astype(in_dt).reshape(self.ncrops, B, D)
        tb = self._cls_rows(B, D, in_bytes)
        nbt = B // tb
        ce_rows, csum = _cls_pair_losses(
            t_cls3, s_cls3, self.center.astype(jnp.float32),
            temp=temp, student_temp=self.student_temp,
            ngcrops=self.ngcrops, ncrops=self.ncrops,
            tb=tb, vmem_limit=self._vmem_limit)
        n_loss_terms1 = B * self.ngcrops * (self.ncrops - 1)
        total_loss1 = jnp.sum(ce_rows) / n_loss_terms1 * self.lambda1
        cls_sum = jnp.sum(csum.reshape(self.ngcrops, nbt, 8, D)[:, :, 0, :],
                          axis=(0, 1))[None, :]

        # ---- loss3: masked patch MIM cross-entropy (+ fused patch center sum) ----
        if self.lambda3 > 0:
            tbp, chunk, n_pad = self._patch_tiles(B, N, D2, in_bytes)
            nbt2 = B // tbp
            t_patch = teacher_patch.astype(in_dt)
            s_patch = student_patch.astype(in_dt)
            mask_flat = student_mask.reshape(self.ngcrops, B, -1).astype(jnp.float32)
            if n_pad != N:   # pad the patch axis; padded mask entries are zero
                pad3 = ((0, 0), (0, n_pad - N), (0, 0))
                t_patch = jnp.pad(t_patch, pad3)
                s_patch = jnp.pad(s_patch, pad3)
                mask_flat = jnp.pad(mask_flat, ((0, 0), (0, 0), (0, n_pad - N)))
            n_chunks = n_pad // chunk
            mask_chunked = mask_flat.reshape(self.ngcrops, B, n_chunks, chunk
                                             ).transpose(0, 2, 1, 3)
            num, den, psum = _mim_losses(
                t_patch, s_patch, self.center2.astype(jnp.float32), mask_chunked,
                temp2=temp2, student_temp=self.student_temp, ngcrops=self.ngcrops,
                tbp=tbp, chunk=chunk, vmem_limit=self._vmem_limit)
            per_row = num[:, :, 0] / jnp.maximum(den[:, :, 0], 1.0)   # (ng, B)
            total_loss3 = jnp.sum(jnp.mean(per_row, axis=1)) / self.ngcrops * self.lambda3
            patch_sum = jnp.sum(psum.reshape(self.ngcrops, nbt2, 8, D2)[:, :, 0, :],
                                axis=(0, 1))[None, :]
        else:
            total_loss3 = jnp.float32(0.0)
            patch_sum = jnp.sum(teacher_patch.astype(jnp.float32), axis=(0, 1))[None, :]

        # TODO(synk): lambda2 patch-matching (EMD) branch depends on external
        # utils.list_duplicates / crops_in_same_class and data-dependent argmax
        # gathers; not ported (run with lambda2 == 0).
        total_loss2 = jnp.float32(0.0)

        # ---- update_center (single device: dist world_size == 1) ----
        cls_center = cls_sum / M
        patch_center = patch_sum / (M * N)
        self.center = (self.center * self.center_momentum
                       + cls_center * (1.0 - self.center_momentum))
        self.center2 = (self.center2 * self.center_momentum2
                        + patch_center[:, None, :] * (1.0 - self.center_momentum2))

        return dict(cls=total_loss1, patch=total_loss2, mim=total_loss3,
                    loss=total_loss1 + total_loss2 + total_loss3)


# --------------------------------------------------------------------------
# Pure-JAX reference (mirrors the PyTorch forward on the same path)
# --------------------------------------------------------------------------
def reference_forward(student_cls, student_patch, teacher_cls, teacher_patch,
                      student_local_cls, student_mask, temp, temp2,
                      center, center2, student_temp, ngcrops, ncrops,
                      lambda1, lambda3):
    s_cls = jnp.concatenate([student_cls, student_local_cls], axis=0) / student_temp
    s_cls_c = jnp.split(s_cls, ncrops, axis=0)
    s_patch_c = jnp.split(student_patch / student_temp, ngcrops, axis=0)
    t_cls_c = jnp.split(jax.nn.softmax((teacher_cls - center) / temp, axis=-1), ngcrops, axis=0)
    t_patch_c = jnp.split(jax.nn.softmax((teacher_patch - center2) / temp2, axis=-1), ngcrops, axis=0)

    total1, n1 = 0.0, 0
    for q in range(ngcrops):
        for v in range(ncrops):
            if v != q:
                l = jnp.sum(-t_cls_c[q] * jax.nn.log_softmax(s_cls_c[v], axis=-1), axis=-1)
                total1 = total1 + jnp.sum(l)
                n1 += l.shape[0]
    total1 = total1 / n1 * lambda1

    total3 = 0.0
    for i in range(ngcrops):
        l = jnp.sum(-t_patch_c[i] * jax.nn.log_softmax(s_patch_c[i], axis=-1), axis=-1)
        m = student_mask[i].reshape(student_mask.shape[1], -1).astype(jnp.float32)
        l = jnp.sum(l * m, axis=-1) / jnp.maximum(jnp.sum(m, axis=-1), 1.0)
        total3 = total3 + jnp.mean(l)
    total3 = total3 / ngcrops * lambda3
    return total1, total3


if __name__ == "__main__":
    # Small deterministic sizes that still exercise B-tiling, patch chunking
    # with padding (N=25 -> 32), the diagonal-skip grid and parallel axes.
    B = 16
    ngcrops, nlcrops = 2, 2
    ncrops = ngcrops + nlcrops
    out_dim = 256
    patch_out_dim = 128
    H = W = 5
    N = H * W
    epoch = 3

    key = jax.random.PRNGKey(0)
    ks = jax.random.split(key, 6)
    student_cls_g = jax.random.normal(ks[0], (ngcrops * B, out_dim), jnp.float32)
    student_patch = jax.random.normal(ks[1], (ngcrops * B, N, patch_out_dim), jnp.float32)
    teacher_cls = jax.random.normal(ks[2], (ngcrops * B, out_dim), jnp.float32)
    teacher_patch = jax.random.normal(ks[3], (ngcrops * B, N, patch_out_dim), jnp.float32)
    student_local_cls = jax.random.normal(ks[4], (nlcrops * B, out_dim), jnp.float32)
    student_mask = jax.random.bernoulli(ks[5], 0.5, (ngcrops, B, H, W))

    loss_mod = SMKDLossPallas(
        out_dim=out_dim, patch_out_dim=patch_out_dim,
        ngcrops=ngcrops, nlcrops=nlcrops,
        warmup_teacher_temp=0.04, teacher_temp=0.07,
        warmup_teacher_temp2=0.04, teacher_temp2=0.07,
        warmup_teacher_temp_epochs=5, nepochs=10,
        lambda1=1.0, lambda2=0.0, lambda3=1.0,
        cls_block_rows=8, patch_block_rows=8, patch_chunk=8)

    temp = float(loss_mod.teacher_temp_schedule[epoch])
    temp2 = float(loss_mod.teacher_temp2_schedule[epoch])
    center0, center20 = loss_mod.center, loss_mod.center2

    student_output = [(student_cls_g, student_patch)]
    teacher_output = [(teacher_cls, teacher_patch)]

    out = loss_mod(student_output, teacher_output, student_local_cls,
                   student_mask, epoch)
    jax.block_until_ready(out["loss"])
    jax.block_until_ready(loss_mod.center)
    jax.block_until_ready(loss_mod.center2)

    # Reference uses the same bf16-rounded inputs the kernels stream.
    def _cast(x):
        return x.astype(jnp.bfloat16).astype(jnp.float32)

    sc, sp = _cast(student_cls_g), _cast(student_patch)
    tc, tp = _cast(teacher_cls), _cast(teacher_patch)
    slc = _cast(student_local_cls)
    ref1, ref3 = reference_forward(sc, sp, tc, tp, slc, student_mask,
                                   temp, temp2, center0, center20,
                                   loss_mod.student_temp, ngcrops, ncrops,
                                   loss_mod.lambda1, loss_mod.lambda3)
    ref_c = center0 * 0.9 + (jnp.sum(tc, axis=0, keepdims=True) / tc.shape[0]) * 0.1
    ref_c2 = center20 * 0.9 + (jnp.sum(jnp.mean(tp, axis=1), axis=0,
                                       keepdims=True) / tp.shape[0]) * 0.1

    np.testing.assert_allclose(np.asarray(out["cls"]), np.asarray(ref1), rtol=2e-3, atol=1e-3)
    np.testing.assert_allclose(np.asarray(out["mim"]), np.asarray(ref3), rtol=2e-3, atol=1e-3)
    np.testing.assert_allclose(np.asarray(out["loss"]), np.asarray(ref1 + ref3), rtol=2e-3, atol=1e-3)
    np.testing.assert_allclose(np.asarray(loss_mod.center), np.asarray(ref_c), rtol=1e-3, atol=1e-5)
    np.testing.assert_allclose(np.asarray(loss_mod.center2), np.asarray(ref_c2), rtol=1e-3, atol=1e-5)

    print("KERNEL_OK")
</pallas_src>

<mosaic_0001>
module attributes {stable_mosaic.version = 11 : i64} {
  func.func @_cls_loss_kernel(%arg0: i32, %arg1: i32, %arg2: i32, %arg3: memref<1x8x256xbf16, #tpu.memory_space<vmem>>, %arg4: memref<1x8x256xbf16, #tpu.memory_space<vmem>>, %arg5: memref<1x256xf32, #tpu.memory_space<vmem>>, %arg6: memref<1x1x8x1xf32, #tpu.memory_space<vmem>>, %arg7: memref<1x8x256xf32, #tpu.memory_space<vmem>>, %arg8: memref<8x256xf32, #tpu.memory_space<vmem>>, %arg9: memref<8x1xf32, #tpu.memory_space<vmem>>) attributes {dimension_semantics = [#tpu.dimension_semantics<parallel>, #tpu.dimension_semantics<parallel>, #tpu.dimension_semantics<arbitrary>], iteration_bounds = array<i64: 2, 2, 3>, scalar_prefetch = 0 : i64, scratch_operands = 2 : i64, tpu.core_type = #tpu.core_type<tc>, window_params = [{transform_indices = @transform_0, window_bounds = array<i64: 1, 8, 256>}, {transform_indices = @transform_1, window_bounds = array<i64: 1, 8, 256>}, {pipeline_mode = #tpu.pipeline_mode<synchronous>, transform_indices = @transform_2, window_bounds = array<i64: 1, 256>}, {transform_indices = @transform_3, window_bounds = array<i64: 1, 1, 8, 1>}, {transform_indices = @transform_4, window_bounds = array<i64: 1, 8, 256>}]} {
    %c0_i32 = arith.constant 0 : i32
    %0 = arith.cmpi eq, %arg2, %c0_i32 : i32
    %1 = arith.extui %0 : i1 to i32
    %c0_i32_0 = arith.constant 0 : i32
    %2 = arith.cmpi ne, %1, %c0_i32_0 : i32
    scf.if %2 {
      %c0_14 = arith.constant 0 : index
      %c0_15 = arith.constant 0 : index
      %c0_16 = arith.constant 0 : index
      %25 = vector.load %arg3[%c0_14, %c0_15, %c0_16] : memref<1x8x256xbf16, #tpu.memory_space<vmem>>, vector<1x8x256xbf16>
      %26 = vector.shape_cast %25 : vector<1x8x256xbf16> to vector<8x256xbf16>
      %27 = arith.extf %26 : vector<8x256xbf16> to vector<8x256xf32>
      %cst_17 = arith.constant dense<0.000000e+00> : vector<256xf32>
      %28 = vector.multi_reduction <add>, %27, %cst_17 [0] : vector<8x256xf32> to vector<256xf32>
      %29 = vector.shape_cast %28 : vector<256xf32> to vector<1x256xf32>
      %30 = vector.shape_cast %29 : vector<1x256xf32> to vector<1x1x256xf32>
      %31 = vector.shape_cast %30 : vector<1x1x256xf32> to vector<1x1x256xf32>
      %32 = vector.broadcast %31 : vector<1x1x256xf32> to vector<1x8x256xf32>
      %c0_18 = arith.constant 0 : index
      %c0_19 = arith.constant 0 : index
      %c0_20 = arith.constant 0 : index
      %33 = vector.load %arg7[%c0_18, %c0_19, %c0_20] : memref<1x8x256xf32, #tpu.memory_space<vmem>>, vector<1x8x256xf32>
      tpu.vector_store %arg7[%c0_18, %c0_19, %c0_20], %32 {strides = array<i32>} : memref<1x8x256xf32, #tpu.memory_space<vmem>>, vector<1x8x256xf32>,
      %c0_21 = arith.constant 0 : index
      %c0_22 = arith.constant 0 : index
      %34 = vector.load %arg5[%c0_21, %c0_22] : memref<1x256xf32, #tpu.memory_space<vmem>>, vector<1x256xf32>
      %35 = vector.broadcast %34 : vector<1x256xf32> to vector<8x256xf32>
      %36 = arith.subf %27, %35 : vector<8x256xf32>
      %cst_23 = arith.constant 1.600000e+01 : f32
      %37 = vector.broadcast %cst_23 : f32 to vector<8x256xf32>
      %38 = arith.mulf %36, %37 : vector<8x256xf32>
      %cst_24 = arith.constant dense<0xFF800000> : vector<8xf32>
      %39 = vector.multi_reduction <maximumf>, %38, %cst_24 [1] : vector<8x256xf32> to vector<8xf32>
      %40 = vector.shape_cast %39 : vector<8xf32> to vector<8x1xf32>
      %41 = vector.broadcast %40 : vector<8x1xf32> to vector<8x256xf32>
      %42 = arith.subf %38, %41 : vector<8x256xf32>
      %43 = math.exp %42 : vector<8x256xf32>
      %c0_25 = arith.constant 0 : index
      %c0_26 = arith.constant 0 : index
      %44 = vector.load %arg8[%c0_25, %c0_26] : memref<8x256xf32, #tpu.memory_space<vmem>>, vector<8x256xf32>
      tpu.vector_store %arg8[%c0_25, %c0_26], %43 {strides = array<i32>} : memref<8x256xf32, #tpu.memory_space<vmem>>, vector<8x256xf32>,
      %cst_27 = arith.constant dense<0.000000e+00> : vector<8xf32>
      %45 = vector.multi_reduction <add>, %43, %cst_27 [1] : vector<8x256xf32> to vector<8xf32>
      %46 = vector.shape_cast %45 : vector<8xf32> to vector<8x1xf32>
      %c0_28 = arith.constant 0 : index
      %c0_29 = arith.constant 0 : index
      %47 = vector.load %arg9[%c0_28, %c0_29] : memref<8x1xf32, #tpu.memory_space<vmem>>, vector<8x1xf32>
      tpu.vector_store %arg9[%c0_28, %c0_29], %46 {strides = array<i32>} : memref<8x1xf32, #tpu.memory_space<vmem>>, vector<8x1xf32>,
    } else {
    }
    %c0 = arith.constant 0 : index
    %c0_1 = arith.constant 0 : index
    %c0_2 = arith.constant 0 : index
    %3 = vector.load %arg4[%c0, %c0_1, %c0_2] : memref<1x8x256xbf16, #tpu.memory_space<vmem>>, vector<1x8x256xbf16>
    %4 = vector.shape_cast %3 : vector<1x8x256xbf16> to vector<8x256xbf16>
    %5 = arith.extf %4 : vector<8x256xbf16> to vector<8x256xf32>
    %cst = arith.constant 1.000000e+01 : f32
    %6 = vector.broadcast %cst : f32 to vector<8x256xf32>
    %7 = arith.mulf %5, %6 : vector<8x256xf32>
    %cst_3 = arith.constant dense<0xFF800000> : vector<8xf32>
    %8 = vector.multi_reduction <maximumf>, %7, %cst_3 [1] : vector<8x256xf32> to vector<8xf32>
    %9 = vector.shape_cast %8 : vector<8xf32> to vector<8x1xf32>
    %10 = vector.broadcast %9 : vector<8x1xf32> to vector<8x256xf32>
    %11 = arith.subf %7, %10 : vector<8x256xf32>
    %12 = math.exp %11 : vector<8x256xf32>
    %cst_4 = arith.constant dense<0.000000e+00> : vector<8xf32>
    %13 = vector.multi_reduction <add>, %12, %cst_4 [1] : vector<8x256xf32> to vector<8xf32>
    %14 = vector.shape_cast %13 : vector<8xf32> to vector<8x1xf32>
    %15 = math.log %14 : vector<8x1xf32>
    %c0_5 = arith.constant 0 : index
    %c0_6 = arith.constant 0 : index
    %16 = vector.load %arg8[%c0_5, %c0_6] : memref<8x256xf32, #tpu.memory_space<vmem>>, vector<8x256xf32>
    %17 = arith.mulf %16, %11 : vector<8x256xf32>
    %cst_7 = arith.constant dense<0.000000e+00> : vector<8xf32>
    %18 = vector.multi_reduction <add>, %17, %cst_7 [1] : vector<8x256xf32> to vector<8xf32>
    %19 = vector.shape_cast %18 : vector<8xf32> to vector<8x1xf32>
    %c0_8 = arith.constant 0 : index
    %c0_9 = arith.constant 0 : index
    %20 = vector.load %arg9[%c0_8, %c0_9] : memref<8x1xf32, #tpu.memory_space<vmem>>, vector<8x1xf32>
    %21 = arith.divf %19, %20 : vector<8x1xf32>
    %22 = arith.subf %15, %21 : vector<8x1xf32>
    %23 = vector.shape_cast %22 : vector<8x1xf32> to vector<1x1x8x1xf32>
    %c0_10 = arith.constant 0 : index
    %c0_11 = arith.constant 0 : index
    %c0_12 = arith.constant 0 : index
    %c0_13 = arith.constant 0 : index
    %24 = vector.load %arg6[%c0_10, %c0_11, %c0_12, %c0_13] : memref<1x1x8x1xf32, #tpu.memory_space<vmem>>, vector<1x1x8x1xf32>
    tpu.vector_store %arg6[%c0_10, %c0_11, %c0_12, %c0_13], %23 {strides = array<i32>} : memref<1x1x8x1xf32, #tpu.memory_space<vmem>>, vector<1x1x8x1xf32>,
    return
  }
  func.func @transform_0(%arg0: i32, %arg1: i32, %arg2: i32) -> (i32, i32, i32) {
    %c0_i32 = arith.constant 0 : i32
    %c0_i32_0 = arith.constant 0 : i32
    return %arg0, %arg1, %c0_i32 : i32, i32, i32
  }
  func.func @transform_1(%arg0: i32, %arg1: i32, %arg2: i32) -> (i32, i32, i32) {
    %0 = arith.cmpi sge, %arg2, %arg0 : i32
    %c1_i32 = arith.constant 1 : i32
    %c0_i32 = arith.constant 0 : i32
    %1 = arith.select %0, %c1_i32, %c0_i32 : i32
    %2 = arith.addi %arg2, %1 : i32
    %c0_i32_0 = arith.constant 0 : i32
    %c0_i32_1 = arith.constant 0 : i32
    return %2, %arg1, %c0_i32_0 : i32, i32, i32
  }
  func.func @transform_2(%arg0: i32, %arg1: i32, %arg2: i32) -> (i32, i32) {
    %c0_i32 = arith.constant 0 : i32
    %c0_i32_0 = arith.constant 0 : i32
    %c0_i32_1 = arith.constant 0 : i32
    return %c0_i32, %c0_i32_0 : i32, i32
  }
  func.func @transform_3(%arg0: i32, %arg1: i32, %arg2: i32) -> (i32, i32, i32, i32) {
    %c0_i32 = arith.constant 0 : i32
    %c0_i32_0 = arith.constant 0 : i32
    return %arg0, %arg2, %arg1, %c0_i32 : i32, i32, i32, i32
  }
  func.func @transform_4(%arg0: i32, %arg1: i32, %arg2: i32) -> (i32, i32, i32) {
    %c0_i32 = arith.constant 0 : i32
    %c0_i32_0 = arith.constant 0 : i32
    return %arg0, %arg1, %c0_i32 : i32, i32, i32
  }
}

</mosaic_0001>

<bundles_post_ra>
// kernel: tpu_custom_call.1
= control target key start
LH: loop header
LB: loop body
LE: loop exit
PB: predicated region body
PF: predicated region fallthrough
CT: control target
= control target key end

     0   :  { %s1376_s0 = inlined_call_operand.hbm [shape: bf16[2,16,256], index: 0, kind: input, shape index: {}]   ;;  %s1377_s1 = inlined_call_operand.hbm [shape: bf16[4,16,256], index: 1, kind: input, shape index: {}]   ;;  %s1378_s2 = inlined_call_operand.hbm [shape: f32[1,256], index: 2, kind: input, shape index: {}]   ;;  %s1379_s3 = inlined_call_operand.vmem [shape: f32[2,3,16,1], index: 3, kind: output, shape index: {0}]   ;;  %s1380_s4 = inlined_call_operand.hbm [shape: f32[2,16,256], index: 4, kind: output, shape index: {1}]  }
   0x1   :  { %1394 = sst [smem:[#allocation26_spill]] %s1378_s2 }
   0x2   :  { %1395 = sst [smem:[#allocation27_spill]] %s1379_s3 }
   0x3   :  { %1396 = sst [smem:[#allocation28_spill]] %s1380_s4 }
   0x4   :  { %10 = vsyncpa [#allocation5], 0 }
   0x5   :  { %12 = vsyncpa [#allocation5 + $0x1], 0 }
   0x6   :  { %13 = vsyncpa [#allocation8], 0 }
   0x7   :  { %15 = vsyncpa [#allocation8 + $0x1], 0 }
   0x8   :  { %16 = vsyncpa [#allocation6], 0 }
   0x9   :  { %18 = vsyncpa [#allocation6 + $0x1], 0  ;;  %s1083_s15 = smov 0   ;;  %s1085_s16 = smov 0  }
   0xa   :  { %s1087_s17 = smov 0   ;;  %s1089_s18 = smov 0  }
   0xb   :  { %s1091_s19 = smov 0   ;;  %s1093_s20 = smov 0  }
   0xc   :  { %s1095_s21 = smov 0   ;;  %s1097_s22 = smov 0  }
   0xd   :  { %s1099_s23 = smov 0   ;;  %s1101_s24 = smov 0  }
   0xe   :  { %s1103_s25 = smov 0   ;;  %s1105_s26 = smov 0  }
   0xf   :  { %s1107_s27 = smov 0  }
  0x10 LB: > { %1397 = sst [smem:[#allocation15_spill]] %s1031_s21  ;;  %s1147_s28 = sadd.s32 4294967295, %s1055_s27   ;;  %s1055_s27 = sphi %s1107_s27, %s24_s27   ;;  %s1051_s26 = sphi %s1105_s26, %s1432_s26   ;;  %s1047_s25 = sphi %s1103_s25, %s1431_s25   ;;  %s1043_s24 = sphi %s1101_s24, %s1430_s24   ;;  %s1039_s23 = sphi %s1099_s23, %s1429_s23   ;;  %s1035_s22 = sphi %s1097_s22, %s1428_s22   ;;  %s1031_s21 = sphi %s1095_s21, %s1427_s21   ;;  %s1027_s20 = sphi %s1093_s20, %s1438_s20   ;;  %s1023_s19 = sphi %s1091_s19, %s1437_s19   ;;  %s1019_s18 = sphi %s1089_s18, %s1436_s18   ;;  %s1015_s17 = sphi %s1087_s17, %s1435_s17   ;;  %s1011_s16 = sphi %s1085_s16, %s1434_s16   ;;  %s1007_s15 = sphi %s1083_s15, %s1433_s15  }
  0x11   : > { %1398 = sst [smem:[#allocation16_spill]] %s1035_s22  ;;  %p99_p0 = scmp.ne.s32.totalorder %s1011_s16, %s1007_s15 }
  0x12   : > { %1399 = sst [smem:[#allocation17_spill]] %s1043_s24  ;;  %p1382_p1 = scmp.eq.s32.totalorder %s1147_s28, 0 }
  0x13   : > { %1400 = sst [smem:[#allocation18_spill]] %s1047_s25  ;;  %p176_p2 = scmp.eq.s32.totalorder %s1147_s28, 11 }
  0x14   : > { %1401 = sst [smem:[#allocation19_spill]] %s1051_s26  ;;  %p647_p3 = scmp.ge.s32.totalorder %s1055_s27, 1 }
  0x15   : > { %p189_p4 = scmp.lt.s32.totalorder %s1055_s27, 13  ;;  %p1156_p5 = por %p99_p0, %p1382_p1 }
  0x16   : > { %s1404_s2 = sld [smem:[#allocation26_spill]]  ;;  %s1057_s8 = smov [#allocation9]  }
  0x17   : > { %p1160_p6 = pnand %p647_p3, %p189_p4  ;;  %s203_s9 = sshll.u32 %s1057_s8, 4  ;;  %s204_s9 = int_to_ptr.vmem [resolvable:$true] %s203_s9 }
  0x18   : > { %s646_s10 = sadd.s32 4294967294, %s1055_s27   ;;  %s36_s11 = sadd.s32 1, %s1043_s24 }
  0x19   : > { %p683_p7 = pneg %p1160_p6  ;;  %p37_p9 = scmp.ge.s32.totalorder %s36_s11, 3 }
  0x1a   : > { %s39_s12 = sadd.s32 1, %s1047_s25  ;;  %s43_s13 = sadd.s32 1, %s1051_s26 }
  0x1b   : > { %p684_p8 = pnand %p683_p7, %p1382_p1  ;;  %s52_s14 = sadd.s32 1, %s1027_s20 }
  0x1c   : > { %s201_s7 = sshll.u32 %s1404_s2, 4  ;;  %s1440_s11 = smov (%p37_p9, %s36_s11), 0  ;;  %s202_s7 = int_to_ptr.hbm [resolvable:$true] %s201_s7 }
  0x1d   : > { %686 = dma.hbm_to_vmem [thread:$0]  (!%p684_p8), %s202_s7, 32, %s204_s9, [#allocation8]  }
  0x1e   : > { %1405 = sst [smem:[#allocation20_spill]] %s1440_s11  ;;  %s1442_s12 = smov (!%p37_p9, %s39_s12), %s1047_s25 }
  0x1f   : > { %p59_p10 = scmp.ne.s32.totalorder %s1027_s20, %s1023_s19  ;;  %p60_p11 = scmp.eq.s32.totalorder %s1055_s27, 0 }
  0x20   : > { %p41_p12 = scmp.ge.s32.totalorder %s1442_s12, 2  ;;  %p65_p13 = scmp.ne.s32.totalorder %s1023_s19, %s1019_s18 }
  0x21   : > { %p1186_p0 = por %p60_p11, %p59_p10  ;;  %p75_p3 = scmp.ge.s32.totalorder %s1043_s24, %s1051_s26 }
  0x22   : > { %s1444_s12 = smov (%p41_p12, %s1442_s12), 0  ;;  %s1446_s13 = smov (!%p41_p12, %s43_s13), %s1051_s26 }
  0x23   : > { %1407 = sst [smem:[#allocation21_spill]] %s1444_s12  ;;  %s48_s5 = ssub.s32 %s1047_s25, %s1444_s12 }
  0x24   : > { %p1202_p4 = por %p1382_p1, %p65_p13  ;;  %p45_p7 = scmp.ge.s32.totalorder %s1446_s13, 2 }
  0x25   : > { %p1208_p8 = por %p176_p2, %p59_p10  ;;  %p182_p9 = scmp.eq.s32.totalorder %s646_s10, 11 }
  0x26   : > { %s76_s8 = scalar_select %p75_p3, 1, 0 }
  0x27   : > { %s1409_s7 = scalar_select %p1208_p8, 1, 0 }
  0x28   : > { %s1448_s13 = smov (%p45_p7, %s1446_s13), 0  ;;  %s1215_s9 = sadd.s32 %s1043_s24, %s76_s8 }
  0x29   : > { %1410 = sst [smem:[#allocation22_spill]] %s1409_s7  ;;  %s47_s2 = ssub.s32 %s1051_s26, %s1448_s13 }
  0x2a   : > { %1411 = sst [smem:[#allocation23_spill]] %s1448_s13  ;;  %p78_p12 = scmp.ge.s32.totalorder %s1440_s11, %s1448_s13 }
  0x2b   : > { %s49_s12 = sor.u32 %s48_s5, %s47_s2  ;;  %p1224_p1 = por %p182_p9, %p65_p13 }
  0x2c   : > { %p50_p2 = scmp.eq.s32.totalorder %s49_s12, 0  ;;  %p699_p10 = scmp.lt.s32.totalorder %s1055_s27, 12 }
  0x2d   : > { %s1412_s4 = scalar_select %p1224_p1, 1, 0 }
  0x2e   : > { %s79_s7 = scalar_select %p78_p12, 1, 0 }
  0x2f   : > { %1413 = sst [smem:[#allocation24_spill]] %s1412_s4  ;;  %s214_s24 = sand.u32 1, %s1027_s20  }
  0x30   : > { %s1230_s3 = scalar_select %p50_p2, %s1027_s20, %s52_s14  }
  0x31   : > { %s80_s8 = sadd.s32 %s79_s7, %s1440_s11  ;;  %s650_s21 = sshll.u32 %s214_s24, 3 }
  0x32   : > { %1414 = sst [smem:[#allocation25_spill]] %s1230_s3  ;;  %s81_s10 = ssub.s32 %s1215_s9, %s80_s8 }
  0x33   : > { %s83_s22 = sor.u32 %s81_s10, %s48_s5  ;;  %s651_s13 = sshll.u32 %s1047_s25, 1 }
  0x34   : > { %p1235_p3 = scmp.eq.s32.totalorder %s83_s22, 0  ;;  %s652_s12 = sshll.u32 %s1051_s26, 2 }
  0x35   : > { %s223_s4 = sadd.s32 %s652_s12, %s651_s13  ;;  %s218_s14 = scalar_lea.vmem [#allocation4], %s650_s21 }
  0x36   : > { %s229_s7 = sshll.u32 %s218_s14, 4  ;;  %s653_s8 = sshll.u32 %s223_s4, 2  ;;  %s230_s7 = int_to_ptr.vmem [resolvable:$true] %s229_s7 }
  0x37   : > { %s225_s10 = scalar_lea.hbm %s1376_s0, %s653_s8  ;;  %p688_p13 = pnand %p699_p10, %p1186_p0 }
  0x38   : > { %s227_s11 = sshll.u32 %s225_s10, 4  ;;  %s656_s26 = sshll.u32 %s1215_s9, 2  ;;  %s228_s11 = int_to_ptr.hbm [resolvable:$true] %s227_s11 }
  0x39   : > { %s215_s25 = scalar_lea.sflag [#allocation5], %s214_s24  ;;  %s248_s12 = sadd.s32 %s656_s26, %s651_s13 }
  0x3a   : > { %690 = dma.hbm_to_vmem [thread:$0]  (!%p688_p13), %s228_s11, 128, %s230_s7, %s215_s25  }
  0x3b   : > { %s236_s21 = sand.u32 1, %s1055_s27   ;;  %s86_s3 = sadd.s32 1, %s1015_s17 }
  0x3c   : > { %p93_p7 = scmp.ne.s32.totalorder %s1015_s17, %s1011_s16  ;;  %s238_s14 = sand.u32 1, %s1015_s17  }
  0x3d   : > { %s1256_s4 = scalar_select %p1235_p3, %s1015_s17, %s86_s3  }
  0x3e   : > { %p95_p9 = por %p93_p7, %p60_p11  ;;  %s657_s8 = sshll.u32 %s248_s12, 2 }
  0x3f   : > { %s654_s15 = sshll.u32 %s238_s14, 3  ;;  %s250_s9 = scalar_lea.hbm %s1377_s1, %s657_s8 }
  0x40   : > { %s252_s10 = sshll.u32 %s250_s9, 4  ;;  %s240_s24 = scalar_lea.vmem [#allocation7], %s654_s15  ;;  %s253_s10 = int_to_ptr.hbm [resolvable:$true] %s252_s10 }
  0x41   : > { %s254_s25 = sshll.u32 %s240_s24, 4  ;;  %p691_p0 = pnand %p699_p10, %p95_p9  ;;  %s255_s25 = int_to_ptr.vmem [resolvable:$true] %s254_s25 }
  0x42   : > { %s237_s26 = scalar_lea.sflag [#allocation8], %s236_s21  ;;  %263 = sbr.rel (%p1160_p6) target bundleno = 616 (0x268), region = 32 }
  0x43   : > { %693 = dma.hbm_to_vmem [thread:$0]  (!%p691_p0), %s253_s10, 128, %s255_s25, %s237_s26  }
  0x44   : > { %s1269_s3 = sand.u32 (!%p1160_p6), 1, %s1023_s19  }
  0x45   : > { %s659_s11 = sshll.u32 (!%p1160_p6), %s1269_s3, 3  ;;  %s266_s13 = scalar_lea.sflag (!%p1160_p6), [#allocation5], %s1269_s3 }
  0x46   : > { %s269_s2 = scalar_lea.vmem (!%p1160_p6), [#allocation4], %s659_s11 }
  0x47   : > { %990 = dma.done.wait (%p1202_p4), %s266_s13, 128  }
  0x48   : > { %992 = vsyncadd (%p1202_p4), %s266_s13, 4294967168  ;;  %s275_s7 = sand.u32 1, %s1147_s28   ;;  %s277_s30 = sand.u32 1, %s1011_s16  }
  0x49   : > { %s1279_s12 = sshll.u32 %s277_s30, 3  ;;  %s276_s21 = scalar_lea.sflag [#allocation8], %s275_s7 }
  0x4a   : > { %s279_s14 = scalar_lea.vmem [#allocation7], %s1279_s12 }
  0x4b   : > { %994 = dma.done.wait (%p1156_p5), %s276_s21, 128  }
  0x4c   : > { %996 = vsyncadd (%p1156_p5), %s276_s21, 4294967168  ;;  %p1416_p6 = scmp.eq.s32.totalorder %s1147_s28, 0 }
  0x4e   : > { %998 = dma.done.wait (%p1416_p6), [#allocation8], 32   ;;  %p1417_p11 = pmov %p1416_p6 }
  0x4f   : > { %s1418_s6 = sld [smem:[#allocation15_spill]]  ;;  %s662_s15 = sshll.u32 %s1269_s3, 4 }
  0x50   : > { %1000 = vsyncadd (%p1417_p11), [#allocation8], 4294967264  ;;  %s1419_s8 = sld [smem:[#allocation16_spill]]  ;;  %p330_p4 = scmp.lt.s32.totalorder %s1039_s23, 1 }
  0x51   : > { %s1420_s11 = sld [smem:[#allocation27_spill]]  ;;  %s1302_s7 = scalar_lea.vmem [#allocation10], %s662_s15 }
  0x52   : > { %s331_s5 = scalar_select %p330_p4, %s1039_s23, 1 }
  0x54   : > { %s672_s9 = smul.u32 6, %s331_s5 }
  0x55   : > { %p332_p12 = scmp.lt.s32.totalorder %s1418_s6, 2  ;;  %p665_p5 = scmp.ne.s32.totalorder %s1418_s6, 0 }
  0x56   : > { %p334_p2 = scmp.lt.s32.totalorder %s1419_s8, 1 }
  0x57   : > { %s333_s22 = scalar_select %p332_p12, %s1418_s6, 2 }
  0x58   : > { %s1450_s8 = smov (!%p334_p2, %s1419_s8), 1 }
  0x59   : > { %s663_s29 = sshll.u32 %s333_s22, 1  ;;  %345 = sbr.rel (%p665_p5) target bundleno = 351 (0x15f), region = 48 }
  0x5a   : > { %s337_s10 = sadd.s32 %s663_s29, %s1450_s8 }
  0x5b   : > { %s339_s24 = sadd.s32 %s672_s9, %s337_s10 }
  0x5c   : > { %s664_s28 = sshll.u32 %s339_s24, 3 }
  0x5d   : > { %s1300_s13 = scalar_lea.vmem %s1420_s11, %s664_s28 }
  0x5e   : > { %v346_v0 = vld [vmem:[%s269_s2] sm:$0xff]  ;;  %vm387_vm0 = vcmask 7168  }
  0x5f   : > { %v363_v1 = vld [vmem:[#allocation9] sm:$0x3]  ;;  %v347_v2 = vunpack.c.l.bf16 %v346_v0  ;;  %v348_v3 = vunpack.c.h.bf16 %v346_v0 }
  0x60   : > { %v365_v4 = vperm.slane %v363_v1, 0  ;;  %v366_v5 = vperm.slane %v363_v1, 1 }
  0x61   : > { %v355_v6 = vrot.slane %v348_v3, 4  ;;  %v349_v9 = vrot.slane %v347_v2, 4 }
  0x62   : > { %v369_v7 = vsub.f32 %v347_v2, %v365_v4  ;;  %v370_v8 = vsub.f32 %v348_v3, %v366_v5 }
  0x63   : > { %v356_v10 = vadd.f32 %v355_v6, %v348_v3  ;;  %v350_v13 = vadd.f32 %v349_v9, %v347_v2 }
  0x64   : > { %v371_v11 = vmul.f32 16.0, %v369_v7  ;;  %v372_v12 = vmul.f32 16.0, %v370_v8 }
  0x65   : > { %v357_v14 = vrot.slane %v356_v10, 2  ;;  %v351_v16 = vrot.slane %v350_v13, 2 }
  0x66   : > { %v373_v15 = vmax.f32 %v371_v11, %v372_v12 }
  0x67   : > { %v358_v17 = vadd.f32 %v357_v14, %v356_v10  ;;  %v352_v18 = vadd.f32 %v351_v16, %v350_v13 }
  0x68   : > { %374 = vmax.xlane.f32.xlu0 %v373_v15 }
  0x69   : > { %v359_v19 = vrot.slane %v358_v17, 1  ;;  %v353_v20 = vrot.slane %v352_v18, 1 }
  0x6b   : > { %v360_v21 = vadd.f32 %v359_v19, %v358_v17  ;;  %v354_v22 = vadd.f32 %v353_v20, %v352_v18 }
  0x6d   : > { %362 = vst [vmem:[%s1302_s7 + $0x8] sm:$0xff] %v360_v21 }
  0x6e   : > { %361 = vst [vmem:[%s1302_s7] sm:$0xff] %v354_v22 }
  0xdb   : > { %v375_v23 = vpop.xlane.xlu0 %374 }
  0xdc   : > { %v376_v24 = vsub.f32 %v371_v11, %v375_v23  ;;  %v377_v25 = vsub.f32 %v372_v12, %v375_v23 }
  0xde   : > { %v378_v26 = vmul.f32 1.442695, %v376_v24  ;;  %v380_v27 = vmul.f32 1.442695, %v377_v25 }
  0xe0   : > { %807 = vpow2.f32 %v378_v26 }
  0xe1   : > { %809 = vpow2.f32 %v380_v27 }
  0xe6   : > { %v808_v28 = vpop.eup %807 }
  0xe7   : > { %v810_v29 = vpop.eup %809  ;;  %382 = vst [vmem:[#allocation2] sm:$0xff] %v808_v28 }
  0xe8   : > { %383 = vst [vmem:[#allocation2 + $0x8] sm:$0xff] %v810_v29  ;;  %v384_v30 = vadd.f32 %v810_v29, %v808_v28 }
  0xea   : > { %385 = vadd.xlane.f32.xlu0 %v384_v30 }
 0x15d   : > { %v386_v31 = vpop.xlane.xlu0 %385 }
 0x15e   : > { %388 = vst.msk [vmem:[#allocation3] sm:$0xff] %vm387_vm0, %v386_v31 }
 0x15f PF: > { %v389_v32 = vld [vmem:[%s279_s14] sm:$0xff]  ;;  %s1421_s2 = sld [smem:[#allocation16_spill]]  ;;  %v408_v39 = vld [vmem:[#allocation2] sm:$0xff]  ;;  %s668_s12 = sshll.u32 %s1039_s23, 2 }
 0x160   : > { %v390_v33 = vunpack.c.l.bf16 %v389_v32  ;;  %v391_v34 = vunpack.c.h.bf16 %v389_v32  ;;  %v409_v40 = vld [vmem:[#allocation2 + $0x8] sm:$0xff]  ;;  %s1423_s5 = sld [smem:[#allocation28_spill]]  ;;  %s465_s29 = sshll.u32 %s1302_s7, 4  ;;  %s466_s29 = int_to_ptr.vmem [resolvable:$true] %s465_s29 }
 0x161   : > { %s447_s10 = scalar_lea.sflag [#allocation6], %s1269_s3 }
 0x162   : > { %v392_v35 = vmul.f32 10.0, %v390_v33  ;;  %v393_v36 = vmul.f32 10.0, %v391_v34 }
 0x164   : > { %v394_v37 = vmax.f32 %v392_v35, %v393_v36 }
 0x165   : > { %s667_s30 = sshll.u32 %s1421_s2, 1 }
 0x166   : > { %395 = vmax.xlane.f32.xlu0 %v394_v37  ;;  %s461_s21 = sadd.s32 %s668_s12, %s667_s30  ;;  %s929_s26 = scalar_lea.hbm %s1423_s5, 64 }
 0x167   : > { %s669_s6 = sshll.u32 %s461_s21, 3 }
 0x168   : > { %s463_s22 = scalar_lea.hbm %s1423_s5, %s669_s6 }
 0x169   : > { %s467_s9 = sshll.u32 %s463_s22, 4  ;;  %s468_s9 = int_to_ptr.hbm [resolvable:$true] %s467_s9 }
 0x16a   : > { %s923_s24 = sshra.s32 %s468_s9, 4  ;;  %s924_s24 = int_to_ptr.hbm [resolvable:$true] %s923_s24 }
 0x16b   : > { %s925_s28 = scalar_lea.hbm %s924_s24, 16  ;;  %p930_p7 = scmp.lt.s32.totalorder %s924_s24, %s1423_s5 }
 0x16c   : > { %p926_p10 = scmp.ne.s32.totalorder %s924_s24, %s925_s28  ;;  %p931_p9 = scmp.lt.s32.totalorder %s929_s26, %s925_s28 }
 0x16e   : > { %p927_p3 = pnand %p926_p10, %p1208_p8  ;;  %p932_p0 = por %p931_p9, %p930_p7 }
 0x170   : > { %p928_p13 = pneg %p927_p3 }
 0x172   : > { %p933_p6 = pnand %p932_p0, %p928_p13 }
 0x1d9   : > { %v396_v38 = vpop.xlane.xlu0 %395 }
 0x1da   : > { %v397_v41 = vsub.f32 %v392_v35, %v396_v38  ;;  %v398_v42 = vsub.f32 %v393_v36, %v396_v38 }
 0x1dc   : > { %v399_v43 = vmul.f32 1.442695, %v397_v41  ;;  %v401_v44 = vmul.f32 1.442695, %v398_v42  ;;  %v410_v45 = vmul.f32 %v408_v39, %v397_v41  ;;  %v411_v46 = vmul.f32 %v409_v40, %v398_v42 }
 0x1de   : > { %811 = vpow2.f32 %v399_v43  ;;  %v412_v47 = vadd.f32 %v411_v46, %v410_v45 }
 0x1df   : > { %813 = vpow2.f32 %v401_v44 }
 0x1e0   : > { %413 = vadd.xlane.f32.xlu1 %v412_v47 }
 0x1e4   : > { %v812_v48 = vpop.eup %811 }
 0x1e5   : > { %v814_v49 = vpop.eup %813 }
 0x1e6   : > { %v403_v50 = vadd.f32 %v814_v49, %v812_v48 }
 0x1e8   : > { %404 = vadd.xlane.f32.xlu0 %v403_v50 }
 0x1e9   : > { %936 = shalt.err (!%p933_p6)
}
 0x1ea   : > { %681 = dma.vmem_to_hbm [thread:$0]  (%p1208_p8), %s466_s29, 256, %s468_s9, %s447_s10   ;;  %v415_v51 = vld [vmem:[#allocation3] sm:$0xff]  ;;  %vm432_vm5 = vcmask 7168  }
 0x1eb   : > { %815 = vrcp.f32 %v415_v51  ;;  %vm421_vm1 = vweird.f32 %v415_v51  ;;  %v427_v56 = vand.u32 2147483648, %v415_v51  ;;  %v425_v58 = vand.u32 2147483647, %v415_v51 }
 0x1ed   : > { %v428_v60 = vor.u32 1.1754944e-38, %v427_v56  ;;  %vm426_vm4 = vcmp.eq.f32.partialorder %v425_v58, 8.507059e+37 }
 0x1f1   : > { %v816_v52 = vpop.eup %815 }
 0x1f2   : > { %v417_v53 = vmul.f32 %v816_v52, %v415_v51  ;;  %vm422_vm2 = vweird.f32 %v816_v52 }
 0x1f3   : > { %vm423_vm3 = vmor %vm421_vm1, %vm422_vm2 }
 0x1f4   : > { %v418_v54 = vsub.f32 1.0, %v417_v53 }
 0x1f6   : > { %v419_v55 = vmul.f32 %v816_v52, %v418_v54 }
 0x1f8   : > { %v420_v57 = vadd.f32 %v816_v52, %v419_v55 }
 0x1fa   : > { %v424_v61 = vsel %vm423_vm3, %v816_v52, %v420_v57 }
 0x1fb   : > { %v429_v62 = vsel %vm426_vm4, %v428_v60, %v424_v61 }
 0x253   : > { %v414_v63 = vpop.xlane.xlu1 %413 }
 0x254   : > { %v430_v1 = vmul.f32 %v429_v62, %v414_v63 }
 0x25b   : > { %v405_v59 = vpop.xlane.xlu0 %404 }
 0x25c   : > { %817 = vlog2.f32 %v405_v59 }
 0x262   : > { %v818_v0 = vpop.eup %817 }
 0x263   : > { %v407_v2 = vmul.f32 0.6931472, %v818_v0 }
 0x265   : > { %v431_v3 = vsub.f32 %v407_v2, %v430_v1 }
 0x267   : > { %433 = vst.msk [vmem:[%s1300_s13] sm:$0xff] %vm432_vm5, %v431_v3 }
 0x268 PF: > { %p701_p8 = scmp.ge.s32.totalorder %s1055_s27, 2  ;;  %s494_s7 = sand.u32 1, %s1019_s18  }
 0x269   : > { %s495_s30 = scalar_lea.sflag [#allocation6], %s494_s7 }
 0x26a   : > { %p695_p11 = pnand %p701_p8, %p1224_p1 }
 0x26c   : > { %p696_p4 = pneg %p695_p11 }
 0x26e   : > { %1002 = dma.done.wait (%p696_p4), %s495_s30, 256  }
 0x26f   : > { %1004 = vsyncadd (%p696_p4), %s495_s30, 4294967040  ;;  %s24_s27 = sadd.s32 1, %s1055_s27   ;;  %s1426_s13 = sld [smem:[#allocation25_spill]] }
 0x270   : > { %p1332_p12 = scmp.ge.s32.totalorder %s24_s27, 14   ;;  %s1427_s21 = sld [smem:[#allocation17_spill]] }
 0x271   : > { %s1428_s22 = sld [smem:[#allocation18_spill]]  ;;  %s1433_s15 = smov %s1011_s16 }
 0x272   : > { %s1429_s23 = sld [smem:[#allocation19_spill]]  ;;  %s1434_s16 = smov %s1015_s17 }
 0x273   : > { %s1430_s24 = sld [smem:[#allocation20_spill]]  ;;  %s1435_s17 = smov %s1256_s4 }
 0x274   : > { %s1431_s25 = sld [smem:[#allocation21_spill]]  ;;  %s1436_s18 = smov %s1023_s19 }
 0x275   : > { %s1432_s26 = sld [smem:[#allocation23_spill]]  ;;  %s1437_s19 = smov %s1027_s20 }
 0x276   : > { %s1438_s20 = smov %s1426_s13  ;;  %23 = sbr.rel (!%p1332_p12) target bundleno = 16 (0x10), region = 110 }
 0x27b   :  { %501 = vsyncpa [#allocation5], 1 }
 0x27c   :  { %503 = vsyncpa [#allocation5 + $0x1], 1 }
 0x27d   :  { %504 = vsyncpa [#allocation8], 1 }
 0x27e   :  { %506 = vsyncpa [#allocation8 + $0x1], 1 }
 0x27f   :  { %507 = vsyncpa [#allocation6], 1 }
 0x280   :  { %509 = vsyncpa [#allocation6 + $0x1], 1 }

</bundles_post_ra>
